<compile_context>
chip_gen: v6e
topology: v6e:2x2x1
jax: 0.10.0
libtpu: 0.0.40
codegen_flags: <defaults>
</compile_context>

<pallas_src>
import jax
import jax.numpy as jnp
from jax import lax
from jax.experimental import pallas as pl
from jax.experimental.pallas import tpu as pltpu

NEG_MASK = -2.0e30   # score bias on non-edges (finite -> no NaN; exp underflows to 0)
NEG_INIT = -1.0e30   # running-max init; > NEG_MASK so all-masked tiles still give p == 0
_VMEM_LIMIT = 32 * 1024 * 1024


def _pick_tile(n, cap):
    """Largest multiple of 128 that divides n (n itself a multiple of 128), capped."""
    t = min(n, cap)
    while n % t:
        t -= 128
    return t


# --------------------------- projection: z = x @ W^T ---------------------------------

def _proj_kernel(x_ref, wt_ref, z_ref):
    z_ref[...] = jnp.dot(x_ref[...].astype(jnp.bfloat16),
                         wt_ref[...].astype(jnp.bfloat16),
                         preferred_element_type=jnp.float32)


def project(x, w_t, *, tile_m):
    n, f_in = x.shape
    hd = w_t.shape[1]
    assert n % tile_m == 0, (n, tile_m)
    return pl.pallas_call(
        _proj_kernel,
        out_shape=jax.ShapeDtypeStruct((n, hd), jnp.float32),
        grid_spec=pltpu.PrefetchScalarGridSpec(
            num_scalar_prefetch=0,
            grid=(n // tile_m,),
            in_specs=[pl.BlockSpec((tile_m, f_in), lambda i: (i, 0)),
                      pl.BlockSpec((f_in, hd), lambda i: (0, 0))],
            out_specs=pl.BlockSpec((tile_m, hd), lambda i: (i, 0))),
        compiler_params=pltpu.CompilerParams(
            dimension_semantics=("parallel",),
            vmem_limit_bytes=_VMEM_LIMIT),
    )(x, w_t)


# ------------- attention + aggregation + residual + ELU (flash-style, tiled) ---------

def _make_attn_kernel(heads, out_feats, residual, tile_k, sub_k):
    D = out_feats
    n_sub = tile_k // sub_k

    def kernel(*refs):
        if residual:
            (a_ref, z_ref, zt_ref, sd_ref, st_ref, adj_ref, x_ref,
             out_ref, m_sc, l_sc, acc_sc) = refs
        else:
            (a_ref, z_ref, zt_ref, sd_ref, st_ref, adj_ref,
             out_ref, m_sc, l_sc, acc_sc) = refs
            x_ref = None

        j = pl.program_id(1)

        @pl.when(j == 0)
        def _init():
            m_sc[...] = jnp.full_like(m_sc, NEG_INIT)
            l_sc[...] = jnp.zeros_like(l_sc)
            acc_sc[...] = jnp.zeros_like(acc_sc)

        for sk in range(n_sub):                          # in-kernel src sub-tiles
            k0 = sk * sub_k
            # Mask bias computed once per sub-tile, shared by all heads.
            mask_bias = jnp.where(adj_ref[:, k0:k0 + sub_k] > 0, 0.0, NEG_MASK)

            for h in range(heads):
                # Precomputed linear leaky part: slope * (a_h.z_i + a_h.z_j).
                scores = mask_bias + (sd_ref[:, h:h + 1] +
                                      st_ref[h:h + 1, k0:k0 + sub_k])     # (Tq, sub_k)
                # relu part: sum_d (1-slope) * a_hd * relu(z_i[d] + z_j[d]).
                for d in range(D):                        # static unroll, D small
                    c = h * D + d
                    t = (z_ref[:, c:c + 1] +
                         zt_ref[c:c + 1, k0:k0 + sub_k].astype(jnp.float32))
                    scores = scores + a_ref[h, d] * jnp.maximum(t, 0.0)

                # Online softmax update for this (sub-tile, head).
                m_prev = m_sc[h]                                          # (Tq, 1)
                m_new = jnp.maximum(m_prev, jnp.max(scores, axis=-1, keepdims=True))
                corr = jnp.exp(m_prev - m_new)
                p = jnp.exp(scores - m_new)               # non-edges -> exactly 0
                l_sc[h] = corr * l_sc[h] + jnp.sum(p, axis=-1, keepdims=True)
                # p (Tq, sub_k) contracted with z^T (D, sub_k): NT matmul on the MXU,
                # so the src features are streamed only once (no separate z_src input).
                pv = lax.dot_general(
                    p.astype(jnp.bfloat16),
                    zt_ref[h * D:(h + 1) * D, k0:k0 + sub_k],
                    dimension_numbers=(((1,), (1,)), ((), ())),
                    preferred_element_type=jnp.float32)                   # (Tq, D)
                acc_sc[h] = corr * acc_sc[h] + pv         # lane-offset-0 slab store
                m_sc[h] = m_new

        @pl.when(j == pl.num_programs(1) - 1)
        def _finalize():
            for h in range(heads):
                inv = pl.reciprocal(jnp.maximum(l_sc[h], 1e-20), approx=True)
                out_ref[:, h * D:(h + 1) * D] = acc_sc[h] * inv
            o = out_ref[...]                              # (Tq, H*D)
            if residual:
                o = o + x_ref[...]
            # ELU; clamp the exp argument so the untaken branch never produces inf.
            out_ref[...] = jnp.where(o > 0.0, o, jnp.exp(jnp.minimum(o, 0.0)) - 1.0)

    return kernel


def gatv2_layer(x, adj_i8, w_t, attn, *, heads, out_feats, residual,
                negative_slope=0.2, tile_q=128, tile_k_cap=512, sub_k=128):
    n = x.shape[0]
    hd = heads * out_feats
    assert n % tile_q == 0 and n % sub_k == 0, (n, tile_q, sub_k)
    tile_k = _pick_tile(n, tile_k_cap)

    # Projection (bf16 MXU, f32 accumulate), large streaming row tile.
    z = project(x, w_t, tile_m=_pick_tile(n, 512))                        # (N, H*D) f32

    # Cheap wrapper-side layout plumbing / precompute (single small XLA passes):
    z_t = z.astype(jnp.bfloat16).T                                        # (H*D, N) bf16
    s = negative_slope * jnp.einsum(
        'nhd,hd->nh', z.reshape(n, heads, out_feats), attn)               # (N, H) f32
    s_t = s.T                                                             # (H, N) f32
    a_scaled = (1.0 - negative_slope) * attn                              # (H, D) f32

    in_specs = [
        pl.BlockSpec(memory_space=pltpu.MemorySpace.SMEM),                # a_scaled (H, D)
        pl.BlockSpec((tile_q, hd), lambda i, j: (i, 0)),                  # z, dst rows (f32)
        pl.BlockSpec((hd, tile_k), lambda i, j: (0, j)),                  # z^T, src cols (bf16)
        pl.BlockSpec((tile_q, heads), lambda i, j: (i, 0)),               # s, dst linear part
        pl.BlockSpec((heads, tile_k), lambda i, j: (0, j)),               # s^T, src linear part
        pl.BlockSpec((tile_q, tile_k), lambda i, j: (i, j)),              # adjacency (int8)
    ]
    args = [a_scaled, z, z_t, s, s_t, adj_i8]
    if residual:
        in_specs.append(pl.BlockSpec((tile_q, hd), lambda i, j: (i, 0)))  # residual input
        args.append(x)

    kernel = _make_attn_kernel(heads, out_feats, residual, tile_k, sub_k)

    return pl.pallas_call(
        kernel,
        out_shape=jax.ShapeDtypeStruct((n, hd), jnp.float32),
        grid_spec=pltpu.PrefetchScalarGridSpec(
            num_scalar_prefetch=0,
            grid=(n // tile_q, n // tile_k),
            in_specs=in_specs,
            out_specs=pl.BlockSpec((tile_q, hd), lambda i, j: (i, 0)),
            scratch_shapes=[
                pltpu.VMEM((heads, tile_q, 1), jnp.float32),              # running max
                pltpu.VMEM((heads, tile_q, 1), jnp.float32),              # running denominator
                pltpu.VMEM((heads, tile_q, out_feats), jnp.float32),      # per-head accumulator
            ]),
        compiler_params=pltpu.CompilerParams(
            dimension_semantics=("parallel", "arbitrary"),
            vmem_limit_bytes=_VMEM_LIMIT),
    )(*args)


# ----------------------------------- model glue ---------------------------------------

def init_gatv2_params(key, num_layers, in_dim, num_hidden, heads):
    """Deterministic synthetic init. Shapes match DGL GATv2Conv(bias=False, share_weights=True)."""
    params = []
    dim_in = in_dim
    for _ in range(num_layers):
        key, kw, ka = jax.random.split(key, 3)
        h = heads[len(params)]
        w = jax.random.normal(kw, (h * num_hidden, dim_in), jnp.float32) * (1.0 / jnp.sqrt(dim_in))
        a = jax.random.normal(ka, (h, num_hidden), jnp.float32) * (1.0 / jnp.sqrt(num_hidden))
        params.append({"w_t": w.T, "attn": a, "heads": h, "out_feats": num_hidden})
        dim_in = h * num_hidden
    return params


def gatv2_forward(adj, inputs, params, residual=True, tile_q=128):
    """Mirrors GATv2.forward: h = layer(g, h).flatten(1) for each layer."""
    # TODO(synk): feat_drop / attn_drop are eval-mode identity here (deterministic forward).
    n = inputs.shape[0]
    n_pad = tile_q * pl.cdiv(n, tile_q)
    adj_i8 = (adj > 0).astype(jnp.int8)       # int8 mask: 4x less HBM/VMEM than f32 adj
    h = inputs
    if n_pad != n:                            # padded nodes have no edges -> output 0
        adj_i8 = jnp.pad(adj_i8, ((0, n_pad - n), (0, n_pad - n)))
        h = jnp.pad(h, ((0, n_pad - n), (0, 0)))
    for l, p in enumerate(params):
        h = gatv2_layer(h, adj_i8, p["w_t"], p["attn"],
                        heads=p["heads"], out_feats=p["out_feats"],
                        residual=(residual and l > 0),
                        negative_slope=0.2, tile_q=tile_q)
    return h[:n]


def gatv2_reference(adj, inputs, params, residual=True, negative_slope=0.2):
    """Dense pure-JAX reference mirroring the kernel's precision choices:
    bf16 projection matmul (f32 accum), bf16-rounded src features inside the relu part of
    the score (the kernel streams z^T in bf16), f32 linear leaky part, bf16 aggregation."""
    mask = (adj > 0).astype(jnp.float32)
    h = inputs
    for l, p in enumerate(params):
        H, D = p["heads"], p["out_feats"]
        z = jnp.dot(h.astype(jnp.bfloat16), p["w_t"].astype(jnp.bfloat16),
                    preferred_element_type=jnp.float32)
        zb = z.astype(jnp.bfloat16).astype(jnp.float32)
        outs = []
        for hh in range(H):
            zh = z[:, hh * D:(hh + 1) * D]
            zbh = zb[:, hh * D:(hh + 1) * D]
            a = p["attn"][hh]
            lin = negative_slope * (zh @ a)                               # (N,)
            t = zh[:, None, :] + zbh[None, :, :]                          # dst f32 + src bf16-rounded
            rel = (1.0 - negative_slope) * jnp.sum(
                jnp.maximum(t, 0.0) * a[None, None, :], axis=-1)
            s = lin[:, None] + lin[None, :] + rel
            s = jnp.where(mask > 0, s, -1e30)
            m = jnp.max(s, axis=-1, keepdims=True)
            e = jnp.exp(s - m) * mask
            alpha = e / jnp.maximum(jnp.sum(e, axis=-1, keepdims=True), 1e-20)
            o = jnp.dot(alpha.astype(jnp.bfloat16), zh.astype(jnp.bfloat16),
                        preferred_element_type=jnp.float32)
            if residual and l > 0:
                o = o + h[:, hh * D:(hh + 1) * D]
            outs.append(jnp.where(o > 0, o, jnp.exp(jnp.minimum(o, 0.0)) - 1.0))
        h = jnp.concatenate(outs, axis=-1)
    return h


if __name__ == "__main__":
    key = jax.random.PRNGKey(0)

    # Small synthetic sizes; N = 256 gives 2 dst tiles (keeps the "parallel" dst axis
    # split across 2 TensorCores on v7x) and exercises the in-kernel src sub-tile loop.
    N = 256
    in_dim = 16
    num_hidden = 32
    heads = [2, 2]
    num_layers = 2

    key, kx = jax.random.split(key)
    x = jax.random.normal(kx, (N, in_dim), jnp.float32)

    # Deterministic graph: ring (both directions) + self loops; adj[dst, src].
    idx = jnp.arange(N)
    adj = jnp.zeros((N, N), jnp.float32)
    adj = adj.at[idx, idx].set(1.0)
    adj = adj.at[idx, (idx + 1) % N].set(1.0)
    adj = adj.at[idx, (idx - 1) % N].set(1.0)

    params = init_gatv2_params(key, num_layers, in_dim, num_hidden, heads)

    out = gatv2_forward(adj, x, params, residual=True)
    out = jax.block_until_ready(out)

    assert out.shape == (N, heads[-1] * num_hidden), out.shape
    assert bool(jnp.all(jnp.isfinite(out)))

    ref = gatv2_reference(adj, x, params, residual=True)
    assert bool(jnp.allclose(out, ref, rtol=5e-2, atol=5e-2)), \
        float(jnp.max(jnp.abs(out - ref)))

    print("KERNEL_OK")
</pallas_src>

<mosaic_0001>
module attributes {stable_mosaic.version = 11 : i64} {
  func.func @_proj_kernel(%arg0: i32, %arg1: memref<256x16xf32, #tpu.memory_space<vmem>>, %arg2: memref<16x64xf32, #tpu.memory_space<vmem>>, %arg3: memref<256x64xf32, #tpu.memory_space<vmem>>) attributes {dimension_semantics = [#tpu.dimension_semantics<parallel>], iteration_bounds = array<i64: 1>, scalar_prefetch = 0 : i64, scratch_operands = 0 : i64, tpu.core_type = #tpu.core_type<tc>, window_params = [{transform_indices = @transform_0, window_bounds = array<i64: 256, 16>}, {pipeline_mode = #tpu.pipeline_mode<synchronous>, transform_indices = @transform_1, window_bounds = array<i64: 16, 64>}, {transform_indices = @transform_2, window_bounds = array<i64: 256, 64>}]} {
    %c0 = arith.constant 0 : index
    %c0_0 = arith.constant 0 : index
    %0 = vector.load %arg1[%c0, %c0_0] : memref<256x16xf32, #tpu.memory_space<vmem>>, vector<256x16xf32>
    %1 = arith.truncf %0 : vector<256x16xf32> to vector<256x16xbf16>
    %c0_1 = arith.constant 0 : index
    %c0_2 = arith.constant 0 : index
    %2 = vector.load %arg2[%c0_1, %c0_2] : memref<16x64xf32, #tpu.memory_space<vmem>>, vector<16x64xf32>
    %3 = arith.truncf %2 : vector<16x64xf32> to vector<16x64xbf16>
    %cst = arith.constant dense<0.000000e+00> : vector<256x64xf32>
    %4 = tpu.matmul %1, %3, %cst {dimension_numbers = #tpu.dot_dimension_numbers<[1], [0], [0], [1], [0, 0, 1, 1], [], []>} : vector<256x16xbf16>, vector<16x64xbf16>, vector<256x64xf32> -> vector<256x64xf32>
    %c0_3 = arith.constant 0 : index
    %c0_4 = arith.constant 0 : index
    %5 = vector.load %arg3[%c0_3, %c0_4] : memref<256x64xf32, #tpu.memory_space<vmem>>, vector<256x64xf32>
    tpu.vector_store %arg3[%c0_3, %c0_4], %4 {strides = array<i32>} : memref<256x64xf32, #tpu.memory_space<vmem>>, vector<256x64xf32>,
    return
  }
  func.func @transform_0(%arg0: i32) -> (i32, i32) {
    %c0_i32 = arith.constant 0 : i32
    %c0_i32_0 = arith.constant 0 : i32
    return %arg0, %c0_i32 : i32, i32
  }
  func.func @transform_1(%arg0: i32) -> (i32, i32) {
    %c0_i32 = arith.constant 0 : i32
    %c0_i32_0 = arith.constant 0 : i32
    %c0_i32_1 = arith.constant 0 : i32
    return %c0_i32, %c0_i32_0 : i32, i32
  }
  func.func @transform_2(%arg0: i32) -> (i32, i32) {
    %c0_i32 = arith.constant 0 : i32
    %c0_i32_0 = arith.constant 0 : i32
    return %arg0, %c0_i32 : i32, i32
  }
}

</mosaic_0001>

<bundles_post_ra>
// kernel: tpu_custom_call.1
= control target key start
LH: loop header
LB: loop body
LE: loop exit
PB: predicated region body
PF: predicated region fallthrough
CT: control target
= control target key end

     0   :  { %vm63_vm0 = vcmask 130048   ;;  %vm273_vm1 = vcmask 523264   ;;  %s640_s1 = inlined_call_operand.vmem [shape: f32[16,64], index: 1, kind: input, shape index: {}]   ;;  %s641_s0 = inlined_call_operand.vmem [shape: f32[256,16], index: 0, kind: input, shape index: {}]   ;;  %s642_s2 = inlined_call_operand.vmem [shape: f32[256,64], index: 2, kind: output, shape index: {}]  }
   0x1   :  { %v60_v0 = vld [vmem:[%s640_s1] sm:$0xff]  ;;  %v61_v1 = vld [vmem:[%s640_s1 + $0x8] sm:$0xff]  ;;  %v14_v9 = vld [vmem:[%s641_s0 + $0x10] sm:$0xff] }
   0x2   :  { %v12_v2 = vld [vmem:[%s641_s0] sm:$0xff]  ;;  %v62_v3 = vpack.c.bf16 %v61_v1, %v60_v0  ;;  %v13_v4 = vld [vmem:[%s641_s0 + $0x8] sm:$0xff]  ;;  %v15_v10 = vld [vmem:[%s641_s0 + $0x18] sm:$0xff] }
   0x3   :  { %v28_v5 = vld [vmem:[%s641_s0 + $0x80] sm:$0xff]  ;;  %v29_v6 = vld [vmem:[%s641_s0 + $0x88] sm:$0xff]  ;;  %v44_v7 = vpack.c.bf16 %v13_v4, %v12_v2  ;;  %v30_v11 = vld [vmem:[%s641_s0 + $0x90] sm:$0xff]  ;;  %v45_v12 = vpack.c.bf16 %v15_v10, %v14_v9 }
   0x4   :  { %v52_v8 = vpack.c.bf16 %v29_v6, %v28_v5  ;;  %343 = vmatprep.subr.bf16.mxu0 %v62_v3  ;;  %377 = vmatprep.subr.bf16.mxu1 %v62_v3  ;;  %v31_v13 = vld [vmem:[%s641_s0 + $0x98] sm:$0xff]  ;;  %v16_v14 = vld [vmem:[%s641_s0 + $0x20] sm:$0xff]  ;;  %v17_v15 = vld [vmem:[%s641_s0 + $0x28] sm:$0xff] }
   0x5   :  { %344 = vmatpush3.bf16.msra.mxu0 %v62_v3  ;;  %378 = vmatpush3.bf16.msra.mxu1 %v62_v3  ;;  %v53_v16 = vpack.c.bf16 %v31_v13, %v30_v11  ;;  %v46_v17 = vpack.c.bf16 %v17_v15, %v16_v14  ;;  %v32_v18 = vld [vmem:[%s641_s0 + $0xa0] sm:$0xff]  ;;  %v33_v19 = vld [vmem:[%s641_s0 + $0xa8] sm:$0xff]  ;;  %v18_v21 = vld [vmem:[%s641_s0 + $0x30] sm:$0xff] }
   0x6   :  { %345 = vmatprep.mubr.msk.bf16.mxu0 %vm63_vm0, %v44_v7  ;;  %361 = vmatprep.mubr.msk.bf16.mxu1 %vm63_vm0, %v52_v8  ;;  %v54_v20 = vpack.c.bf16 %v33_v19, %v32_v18  ;;  %v19_v22 = vld [vmem:[%s641_s0 + $0x38] sm:$0xff]  ;;  %v34_v23 = vld [vmem:[%s641_s0 + $0xb0] sm:$0xff]  ;;  %v20_v25 = vld [vmem:[%s641_s0 + $0x40] sm:$0xff] }
   0x7   :  { %v35_v24 = vld [vmem:[%s641_s0 + $0xb8] sm:$0xff]  ;;  %v21_v26 = vld [vmem:[%s641_s0 + $0x48] sm:$0xff]  ;;  %v36_v27 = vld [vmem:[%s641_s0 + $0xc0] sm:$0xff]  ;;  %v47_v29 = vpack.c.bf16 %v19_v22, %v18_v21 }
   0x8   :  { %346 = vmatmul.mubr.msk.bf16.vlgmr.msra.gmra.mxu0 %vm63_vm0, %v45_v12  ;;  %362 = vmatmul.mubr.msk.bf16.vlgmr.msra.gmra.mxu1 %vm63_vm0, %v53_v16  ;;  %v37_v28 = vld [vmem:[%s641_s0 + $0xc8] sm:$0xff]  ;;  %v55_v30 = vpack.c.bf16 %v35_v24, %v34_v23  ;;  %v48_v31 = vpack.c.bf16 %v21_v26, %v20_v25  ;;  %v22_v33 = vld [vmem:[%s641_s0 + $0x50] sm:$0xff]  ;;  %v23_v34 = vld [vmem:[%s641_s0 + $0x58] sm:$0xff] }
   0x9   :  { %349 = vmatprep.mubr.msk.bf16.mxu0 %vm63_vm0, %v46_v17  ;;  %365 = vmatprep.mubr.msk.bf16.mxu1 %vm63_vm0, %v54_v20  ;;  %v56_v32 = vpack.c.bf16 %v37_v28, %v36_v27  ;;  %v38_v35 = vld [vmem:[%s641_s0 + $0xd0] sm:$0xff]  ;;  %v39_v36 = vld [vmem:[%s641_s0 + $0xd8] sm:$0xff]  ;;  %v24_v37 = vld [vmem:[%s641_s0 + $0x60] sm:$0xff]  ;;  %v49_v41 = vpack.c.bf16 %v23_v34, %v22_v33 }
   0xa   :  { %v25_v38 = vld [vmem:[%s641_s0 + $0x68] sm:$0xff]  ;;  %v40_v39 = vld [vmem:[%s641_s0 + $0xe0] sm:$0xff]  ;;  %v57_v42 = vpack.c.bf16 %v39_v36, %v38_v35  ;;  %v26_v45 = vld [vmem:[%s641_s0 + $0x70] sm:$0xff] }
   0xb   :  { %v41_v40 = vld [vmem:[%s641_s0 + $0xe8] sm:$0xff]  ;;  %v50_v43 = vpack.c.bf16 %v25_v38, %v24_v37  ;;  %v27_v46 = vld [vmem:[%s641_s0 + $0x78] sm:$0xff]  ;;  %v42_v47 = vld [vmem:[%s641_s0 + $0xf0] sm:$0xff] }
   0xc   :  { %v58_v44 = vpack.c.bf16 %v41_v40, %v40_v39  ;;  %v43_v48 = vld [vmem:[%s641_s0 + $0xf8] sm:$0xff]  ;;  %v51_v49 = vpack.c.bf16 %v27_v46, %v26_v45 }
   0xd   :  { %v59_v50 = vpack.c.bf16 %v43_v48, %v42_v47 }
  0x10   :  { %350 = vmatmul.mubr.msk.bf16.gmra.mxu0 %vm63_vm0, %v47_v29  ;;  %366 = vmatmul.mubr.msk.bf16.gmra.mxu1 %vm63_vm0, %v55_v30 }
  0x11   :  { %353 = vmatprep.mubr.msk.bf16.mxu0 %vm63_vm0, %v48_v31  ;;  %369 = vmatprep.mubr.msk.bf16.mxu1 %vm63_vm0, %v56_v32 }
  0x18   :  { %354 = vmatmul.mubr.msk.bf16.gmra.mxu0 %vm63_vm0, %v49_v41  ;;  %370 = vmatmul.mubr.msk.bf16.gmra.mxu1 %vm63_vm0, %v57_v42 }
  0x19   :  { %357 = vmatprep.mubr.msk.bf16.mxu0 %vm63_vm0, %v50_v43  ;;  %373 = vmatprep.mubr.msk.bf16.mxu1 %vm63_vm0, %v58_v44 }
  0x20   :  { %358 = vmatmul.mubr.msk.bf16.gmra.mxu0 %vm63_vm0, %v51_v49  ;;  %374 = vmatmul.mubr.msk.bf16.gmra.mxu1 %vm63_vm0, %v59_v50 }
  0xc8   :  { %v347_v51 = vpop.f32.mrf.mxu0  ;;  %v363_v52 = vpop.f32.mrf.mxu1 }
  0xc9   :  { %276 = vst.msk [vmem:[%s642_s2 + $0x10] sm:$0xff] %vm273_vm1, %v347_v51  ;;  %292 = vst.msk [vmem:[%s642_s2 + $0x90] sm:$0xff] %vm273_vm1, %v363_v52 }
  0xca   :  { %v146_v53 = vpop.f32.mrf.mxu0  ;;  %v210_v54 = vpop.f32.mrf.mxu1 }
  0xcb   :  { %274 = vst.msk [vmem:[%s642_s2] sm:$0xff] %vm273_vm1, %v146_v53  ;;  %290 = vst.msk [vmem:[%s642_s2 + $0x80] sm:$0xff] %vm273_vm1, %v210_v54 }
  0xcc   :  { %v348_v55 = vpop.f32.mrf.mxu0  ;;  %v364_v56 = vpop.f32.mrf.mxu1 }
  0xcd   :  { %277 = vst.msk [vmem:[%s642_s2 + $0x18] sm:$0xff] %vm273_vm1, %v348_v55  ;;  %293 = vst.msk [vmem:[%s642_s2 + $0x98] sm:$0xff] %vm273_vm1, %v364_v56 }
  0xce   :  { %v149_v57 = vpop.f32.mrf.mxu0  ;;  %v213_v58 = vpop.f32.mrf.mxu1 }
  0xcf   :  { %275 = vst.msk [vmem:[%s642_s2 + $0x8] sm:$0xff] %vm273_vm1, %v149_v57  ;;  %291 = vst.msk [vmem:[%s642_s2 + $0x88] sm:$0xff] %vm273_vm1, %v213_v58 }
  0xd0   :  { %v351_v59 = vpop.f32.mrf.mxu0  ;;  %v367_v60 = vpop.f32.mrf.mxu1 }
  0xd1   :  { %280 = vst.msk [vmem:[%s642_s2 + $0x30] sm:$0xff] %vm273_vm1, %v351_v59  ;;  %296 = vst.msk [vmem:[%s642_s2 + $0xb0] sm:$0xff] %vm273_vm1, %v367_v60 }
  0xd2   :  { %v162_v61 = vpop.f32.mrf.mxu0  ;;  %v226_v62 = vpop.f32.mrf.mxu1 }
  0xd3   :  { %278 = vst.msk [vmem:[%s642_s2 + $0x20] sm:$0xff] %vm273_vm1, %v162_v61  ;;  %294 = vst.msk [vmem:[%s642_s2 + $0xa0] sm:$0xff] %vm273_vm1, %v226_v62 }
  0xd4   :  { %v352_v63 = vpop.f32.mrf.mxu0  ;;  %v368_v0 = vpop.f32.mrf.mxu1 }
  0xd5   :  { %281 = vst.msk [vmem:[%s642_s2 + $0x38] sm:$0xff] %vm273_vm1, %v352_v63  ;;  %297 = vst.msk [vmem:[%s642_s2 + $0xb8] sm:$0xff] %vm273_vm1, %v368_v0 }
  0xd6   :  { %v165_v1 = vpop.f32.mrf.mxu0  ;;  %v229_v2 = vpop.f32.mrf.mxu1 }
  0xd7   :  { %279 = vst.msk [vmem:[%s642_s2 + $0x28] sm:$0xff] %vm273_vm1, %v165_v1  ;;  %295 = vst.msk [vmem:[%s642_s2 + $0xa8] sm:$0xff] %vm273_vm1, %v229_v2 }
  0xd8   :  { %v355_v3 = vpop.f32.mrf.mxu0  ;;  %v371_v4 = vpop.f32.mrf.mxu1 }
  0xd9   :  { %284 = vst.msk [vmem:[%s642_s2 + $0x50] sm:$0xff] %vm273_vm1, %v355_v3  ;;  %300 = vst.msk [vmem:[%s642_s2 + $0xd0] sm:$0xff] %vm273_vm1, %v371_v4 }
  0xda   :  { %v178_v5 = vpop.f32.mrf.mxu0  ;;  %v242_v6 = vpop.f32.mrf.mxu1 }
  0xdb   :  { %282 = vst.msk [vmem:[%s642_s2 + $0x40] sm:$0xff] %vm273_vm1, %v178_v5  ;;  %298 = vst.msk [vmem:[%s642_s2 + $0xc0] sm:$0xff] %vm273_vm1, %v242_v6 }
  0xdc   :  { %v356_v7 = vpop.f32.mrf.mxu0  ;;  %v372_v8 = vpop.f32.mrf.mxu1 }
  0xdd   :  { %285 = vst.msk [vmem:[%s642_s2 + $0x58] sm:$0xff] %vm273_vm1, %v356_v7  ;;  %301 = vst.msk [vmem:[%s642_s2 + $0xd8] sm:$0xff] %vm273_vm1, %v372_v8 }
  0xde   :  { %v181_v9 = vpop.f32.mrf.mxu0  ;;  %v245_v10 = vpop.f32.mrf.mxu1 }
  0xdf   :  { %283 = vst.msk [vmem:[%s642_s2 + $0x48] sm:$0xff] %vm273_vm1, %v181_v9  ;;  %299 = vst.msk [vmem:[%s642_s2 + $0xc8] sm:$0xff] %vm273_vm1, %v245_v10 }
  0xe0   :  { %v359_v11 = vpop.f32.mrf.mxu0  ;;  %v375_v12 = vpop.f32.mrf.mxu1 }
  0xe1   :  { %288 = vst.msk [vmem:[%s642_s2 + $0x70] sm:$0xff] %vm273_vm1, %v359_v11  ;;  %304 = vst.msk [vmem:[%s642_s2 + $0xf0] sm:$0xff] %vm273_vm1, %v375_v12 }
  0xe2   :  { %v194_v13 = vpop.f32.mrf.mxu0  ;;  %v258_v14 = vpop.f32.mrf.mxu1 }
  0xe3   :  { %286 = vst.msk [vmem:[%s642_s2 + $0x60] sm:$0xff] %vm273_vm1, %v194_v13  ;;  %302 = vst.msk [vmem:[%s642_s2 + $0xe0] sm:$0xff] %vm273_vm1, %v258_v14 }
  0xe4   :  { %v360_v15 = vpop.f32.mrf.mxu0  ;;  %v376_v16 = vpop.f32.mrf.mxu1 }
  0xe5   :  { %289 = vst.msk [vmem:[%s642_s2 + $0x78] sm:$0xff] %vm273_vm1, %v360_v15  ;;  %305 = vst.msk [vmem:[%s642_s2 + $0xf8] sm:$0xff] %vm273_vm1, %v376_v16 }
  0xe6   :  { %v197_v17 = vpop.f32.mrf.mxu0  ;;  %v261_v18 = vpop.f32.mrf.mxu1 }
  0xe7   :  { %287 = vst.msk [vmem:[%s642_s2 + $0x68] sm:$0xff] %vm273_vm1, %v197_v17  ;;  %303 = vst.msk [vmem:[%s642_s2 + $0xe8] sm:$0xff] %vm273_vm1, %v261_v18 }

</bundles_post_ra>
